<compile_context>
chip_gen: v7x
topology: tpu7x:2x2x1
jax: 0.10.0
libtpu: 0.0.40
codegen_flags: <defaults>
</compile_context>

<pallas_src>
import functools

import jax
import jax.numpy as jnp
from jax.experimental import pallas as pl
from jax.experimental.pallas import tpu as pltpu


def _masked_smooth_l1_kernel(x_ref, t_ref, m_ref, out_ref, acc_ref):
    j = pl.program_id(1)

    # Reset the per-sample accumulator at the start of each sample's HW sweep.
    @pl.when(j == 0)
    def _():
        acc_ref[...] = jnp.zeros_like(acc_ref)

    x = x_ref[0].astype(jnp.float32)   # (C, T)
    t = t_ref[0].astype(jnp.float32)   # (C, T)
    m = m_ref[0].astype(jnp.float32)   # (1, T) per-(h,w) mask, broadcast over C

    d = x - t
    ad = jnp.abs(d)
    # Smooth L1 with beta = 1 (PyTorch default).
    loss = jnp.where(ad < 1.0, 0.5 * d * d, ad - 0.5)

    # Element-wise accumulate (VPU only); no per-step cross-lane reduce.
    acc_ref[...] += loss * m

    # Finalize once per sample: single reduce, write a lane-dense partial.
    @pl.when(j == pl.num_programs(1) - 1)
    def _():
        total = jnp.sum(acc_ref[...])
        out_ref[...] = jnp.full(out_ref.shape, total, jnp.float32)


def _pick_tile(C, HW, itemsize):
    """Lane-tile T: multiple of 128, <= 2048, input block <= ~1 MiB."""
    max_lanes = max(128, (1 << 20) // max(1, C * itemsize))
    T = min(2048, max_lanes)
    T = max(128, (T // 128) * 128)
    hw128 = ((HW + 127) // 128) * 128
    return min(T, hw128)


@functools.partial(jax.jit, static_argnames=("size_average", "reduce"))
def masked_smooth_l1_loss(inp, target, map_mask, sample_mask,
                          size_average=True, reduce=True):
    """inp/target: [N,C,H,W]; map_mask: [N,H,W]; sample_mask: [N] or None."""
    N, C, H, W = inp.shape
    HW = H * W

    itemsize = jnp.dtype(inp.dtype).itemsize
    T = _pick_tile(C, HW, itemsize)
    HW_pad = ((HW + T - 1) // T) * T
    pad = HW_pad - HW

    # Combined per-(n,h,w) mask (f32); mask sum done in plain JAX (tiny array).
    combined = map_mask.astype(jnp.float32)
    if sample_mask is not None:
        combined = combined * sample_mask.astype(jnp.float32)[:, None, None]
    mask_sum = jnp.sum(combined) * jnp.float32(C)

    x = inp.reshape(N, C, HW)
    t = target.reshape(N, C, HW)
    m = combined.reshape(N, 1, HW)
    if pad:
        x = jnp.pad(x, ((0, 0), (0, 0), (0, pad)))
        t = jnp.pad(t, ((0, 0), (0, 0), (0, pad)))
        m = jnp.pad(m, ((0, 0), (0, 0), (0, pad)))   # zero mask kills padding

    num_hw_blocks = HW_pad // T

    partials = pl.pallas_call(
        _masked_smooth_l1_kernel,
        out_shape=jax.ShapeDtypeStruct((N, 8, 128), jnp.float32),
        grid_spec=pltpu.PrefetchScalarGridSpec(
            num_scalar_prefetch=0,
            grid=(N, num_hw_blocks),
            in_specs=[
                pl.BlockSpec((1, C, T), lambda n, j: (n, 0, j)),
                pl.BlockSpec((1, C, T), lambda n, j: (n, 0, j)),
                pl.BlockSpec((1, 1, T), lambda n, j: (n, 0, j)),
            ],
            out_specs=pl.BlockSpec((1, 8, 128), lambda n, j: (n, 0, 0)),
            scratch_shapes=[pltpu.VMEM((C, T), jnp.float32)],
        ),
        compiler_params=pltpu.CompilerParams(
            dimension_semantics=("parallel", "arbitrary")),
    )(x, t, m)

    # Each sample's partial block is filled with the same scalar; take [n,0,0].
    loss_sum = jnp.sum(partials[:, 0, 0])

    if size_average:
        return (loss_sum / mask_sum).astype(inp.dtype)
    elif reduce:
        return loss_sum.astype(inp.dtype)
    else:
        # TODO(synk): 'reduce=False' (per-element masked loss map) is not wired
        # through this reducing kernel; only reduced modes are supported here.
        raise NotImplementedError("reduce=False not supported in kernel path")


def _reference(inp, target, map_mask, sample_mask):
    d = inp - target
    ad = jnp.abs(d)
    loss = jnp.where(ad < 1.0, 0.5 * d * d, ad - 0.5)
    m = map_mask[:, None, :, :] * sample_mask[:, None, None, None]
    m = jnp.broadcast_to(m, loss.shape).astype(loss.dtype)
    return jnp.sum(loss * m) / jnp.sum(m)


if __name__ == "__main__":
    key = jax.random.PRNGKey(0)
    k1, k2, k3, k4 = jax.random.split(key, 4)

    N, C, H, W = 2, 4, 16, 16
    inp = jax.random.normal(k1, (N, C, H, W), dtype=jnp.float32)
    target = jax.random.normal(k2, (N, C, H, W), dtype=jnp.float32)
    map_mask = (jax.random.uniform(k3, (N, H, W)) > 0.3).astype(jnp.float32)
    sample_mask = (jax.random.uniform(k4, (N,)) > 0.2).astype(jnp.float32)
    # Ensure at least one sample active so the denominator is nonzero.
    sample_mask = sample_mask.at[0].set(1.0)

    out = masked_smooth_l1_loss(inp, target, map_mask, sample_mask)
    out = jax.block_until_ready(out)

    ref = _reference(inp, target, map_mask, sample_mask)
    assert jnp.allclose(out, ref, atol=1e-5, rtol=1e-5), (out, ref)

    print("KERNEL_OK")
</pallas_src>

<mosaic_0001>
module attributes {stable_mosaic.version = 11 : i64} {
  func.func @_masked_smooth_l1_kernel(%arg0: i32, %arg1: i32, %arg2: memref<1x4x256xf32, #tpu.memory_space<vmem>>, %arg3: memref<1x4x256xf32, #tpu.memory_space<vmem>>, %arg4: memref<1x1x256xf32, #tpu.memory_space<vmem>>, %arg5: memref<1x8x128xf32, #tpu.memory_space<vmem>>, %arg6: memref<4x256xf32, #tpu.memory_space<vmem>>) attributes {dimension_semantics = [#tpu.dimension_semantics<parallel>, #tpu.dimension_semantics<arbitrary>], iteration_bounds = array<i64: 2, 1>, scalar_prefetch = 0 : i64, scratch_operands = 1 : i64, tpu.core_type = #tpu.core_type<tc>, window_params = [{transform_indices = @transform_0, window_bounds = array<i64: 1, 4, 256>}, {transform_indices = @transform_1, window_bounds = array<i64: 1, 4, 256>}, {transform_indices = @transform_2, window_bounds = array<i64: 1, 1, 256>}, {transform_indices = @transform_3, window_bounds = array<i64: 1, 8, 128>}]} {
    %c0_i32 = arith.constant 0 : i32
    %0 = arith.cmpi eq, %arg1, %c0_i32 : i32
    %1 = arith.extui %0 : i1 to i32
    %c0_i32_0 = arith.constant 0 : i32
    %2 = arith.cmpi ne, %1, %c0_i32_0 : i32
    scf.if %2 {
      %cst_17 = arith.constant 0.000000e+00 : f32
      %27 = vector.broadcast %cst_17 : f32 to vector<4x256xf32>
      %c0_18 = arith.constant 0 : index
      %c0_19 = arith.constant 0 : index
      %28 = vector.load %arg6[%c0_18, %c0_19] : memref<4x256xf32, #tpu.memory_space<vmem>>, vector<4x256xf32>
      tpu.vector_store %arg6[%c0_18, %c0_19], %27 {strides = array<i32>} : memref<4x256xf32, #tpu.memory_space<vmem>>, vector<4x256xf32>,
    } else {
    }
    %c0 = arith.constant 0 : index
    %c0_1 = arith.constant 0 : index
    %c0_2 = arith.constant 0 : index
    %3 = vector.load %arg2[%c0, %c0_1, %c0_2] : memref<1x4x256xf32, #tpu.memory_space<vmem>>, vector<1x4x256xf32>
    %4 = vector.shape_cast %3 : vector<1x4x256xf32> to vector<4x256xf32>
    %c0_3 = arith.constant 0 : index
    %c0_4 = arith.constant 0 : index
    %c0_5 = arith.constant 0 : index
    %5 = vector.load %arg3[%c0_3, %c0_4, %c0_5] : memref<1x4x256xf32, #tpu.memory_space<vmem>>, vector<1x4x256xf32>
    %6 = vector.shape_cast %5 : vector<1x4x256xf32> to vector<4x256xf32>
    %c0_6 = arith.constant 0 : index
    %c0_7 = arith.constant 0 : index
    %c0_8 = arith.constant 0 : index
    %7 = vector.load %arg4[%c0_6, %c0_7, %c0_8] : memref<1x1x256xf32, #tpu.memory_space<vmem>>, vector<1x1x256xf32>
    %8 = vector.shape_cast %7 : vector<1x1x256xf32> to vector<1x256xf32>
    %9 = arith.subf %4, %6 : vector<4x256xf32>
    %10 = math.absf %9 : vector<4x256xf32>
    %cst = arith.constant 1.000000e+00 : f32
    %11 = vector.broadcast %cst : f32 to vector<4x256xf32>
    %12 = arith.cmpf olt, %10, %11 : vector<4x256xf32>
    %cst_9 = arith.constant 5.000000e-01 : f32
    %13 = vector.broadcast %cst_9 : f32 to vector<4x256xf32>
    %14 = arith.mulf %13, %9 : vector<4x256xf32>
    %15 = arith.mulf %14, %9 : vector<4x256xf32>
    %cst_10 = arith.constant 5.000000e-01 : f32
    %16 = vector.broadcast %cst_10 : f32 to vector<4x256xf32>
    %17 = arith.subf %10, %16 : vector<4x256xf32>
    %18 = arith.select %12, %15, %17 : vector<4x256xi1>, vector<4x256xf32>
    %c0_11 = arith.constant 0 : index
    %c0_12 = arith.constant 0 : index
    %19 = vector.load %arg6[%c0_11, %c0_12] : memref<4x256xf32, #tpu.memory_space<vmem>>, vector<4x256xf32>
    %20 = vector.broadcast %8 : vector<1x256xf32> to vector<4x256xf32>
    %21 = arith.mulf %18, %20 : vector<4x256xf32>
    %22 = arith.addf %19, %21 : vector<4x256xf32>
    %c0_13 = arith.constant 0 : index
    %c0_14 = arith.constant 0 : index
    %23 = vector.load %arg6[%c0_13, %c0_14] : memref<4x256xf32, #tpu.memory_space<vmem>>, vector<4x256xf32>
    tpu.vector_store %arg6[%c0_13, %c0_14], %22 {strides = array<i32>} : memref<4x256xf32, #tpu.memory_space<vmem>>, vector<4x256xf32>,
    %c0_i32_15 = arith.constant 0 : i32
    %24 = arith.cmpi eq, %arg1, %c0_i32_15 : i32
    %25 = arith.extui %24 : i1 to i32
    %c0_i32_16 = arith.constant 0 : i32
    %26 = arith.cmpi ne, %25, %c0_i32_16 : i32
    scf.if %26 {
      %c0_17 = arith.constant 0 : index
      %c0_18 = arith.constant 0 : index
      %27 = vector.load %arg6[%c0_17, %c0_18] : memref<4x256xf32, #tpu.memory_space<vmem>>, vector<4x256xf32>
      %28 = vector.shape_cast %27 : vector<4x256xf32> to vector<1x4x256xf32>
      %cst_19 = arith.constant dense<0.000000e+00> : vector<1xf32>
      %29 = vector.multi_reduction <add>, %28, %cst_19 [1, 2] : vector<1x4x256xf32> to vector<1xf32>
      %30 = vector.shape_cast %29 : vector<1xf32> to vector<1x1x1xf32>
      %31 = vector.extract %30[0, 0, 0] : f32 from vector<1x1x1xf32>
      %32 = vector.broadcast %31 : f32 to vector<1x8x128xf32>
      %c0_20 = arith.constant 0 : index
      %c0_21 = arith.constant 0 : index
      %c0_22 = arith.constant 0 : index
      %33 = vector.load %arg5[%c0_20, %c0_21, %c0_22] : memref<1x8x128xf32, #tpu.memory_space<vmem>>, vector<1x8x128xf32>
      tpu.vector_store %arg5[%c0_20, %c0_21, %c0_22], %32 {strides = array<i32>} : memref<1x8x128xf32, #tpu.memory_space<vmem>>, vector<1x8x128xf32>,
    } else {
    }
    return
  }
  func.func @transform_0(%arg0: i32, %arg1: i32) -> (i32, i32, i32) {
    %c0_i32 = arith.constant 0 : i32
    %c0_i32_0 = arith.constant 0 : i32
    return %arg0, %c0_i32, %arg1 : i32, i32, i32
  }
  func.func @transform_1(%arg0: i32, %arg1: i32) -> (i32, i32, i32) {
    %c0_i32 = arith.constant 0 : i32
    %c0_i32_0 = arith.constant 0 : i32
    return %arg0, %c0_i32, %arg1 : i32, i32, i32
  }
  func.func @transform_2(%arg0: i32, %arg1: i32) -> (i32, i32, i32) {
    %c0_i32 = arith.constant 0 : i32
    %c0_i32_0 = arith.constant 0 : i32
    return %arg0, %c0_i32, %arg1 : i32, i32, i32
  }
  func.func @transform_3(%arg0: i32, %arg1: i32) -> (i32, i32, i32) {
    %c0_i32 = arith.constant 0 : i32
    %c0_i32_0 = arith.constant 0 : i32
    %c0_i32_1 = arith.constant 0 : i32
    return %arg0, %c0_i32, %c0_i32_0 : i32, i32, i32
  }
}

</mosaic_0001>

<bundles_post_ra>
// kernel: masked_smooth_l1_loss.1
= control target key start
LH: loop header
LB: loop body
LE: loop exit
PB: predicated region body
PF: predicated region fallthrough
CT: control target
= control target key end

     0   :  { %s504_s12 = smov 0   ;;  %s506_s13 = smov 0   ;;  %s548_s0 = inlined_call_operand.vmem [shape: f32[2,4,256], index: 0, kind: input, shape index: {}]   ;;  %s549_s1 = inlined_call_operand.vmem [shape: f32[2,4,256], index: 1, kind: input, shape index: {}]   ;;  %s550_s2 = inlined_call_operand.vmem [shape: f32[2,1,256], index: 2, kind: input, shape index: {}]   ;;  %s551_s3 = inlined_call_operand.vmem [shape: f32[2,8,128], index: 3, kind: output, shape index: {}]  }
   0x1   :  { %s508_s14 = smov 0  }
   0x2 LB: > { %s25_s15 = sadd.s32 1, %s478_s13  ;;  %p422_p0 = scmp.ge.s32.totalorder %s482_s14, 1  ;;  %s482_s14 = sphi %s508_s14, %s13_s14   ;;  %s478_s13 = sphi %s506_s13, %s553_s13   ;;  %s474_s12 = sphi %s504_s12, %s552_s12  }
   0x3   : > { %p27_p1 = scmp.ge.s32.totalorder %s25_s15, 2  ;;  %p189_p2 = scmp.lt.s32.totalorder %s482_s14, 3 }
   0x5   : > { %s555_s15 = smov (%p27_p1, %s25_s15), 0  ;;  %p190_p3 = pnand %p422_p0, %p189_p2 }
   0x6   : > { %p234_p4 = scmp.lt.s32.totalorder (!%p190_p3), %s474_s12, 1  ;;  %v283_v0 = vlaneseq (!%p190_p3)  ;;  %vm303_vm1 = vcmask (!%p190_p3), 1043456  }
   0x7   : > { %193 = sbr.rel (%p190_p3) target bundleno = 239 (0xef), region = 32 }
   0x8   : > { %v284_v1 = vshrl.u32 (!%p190_p3), %v283_v0, 7 }
   0xa   : > { %v285_v2 = vsub.s32 (!%p190_p3), 0, %v284_v1  ;;  %v289_v3 = vsub.s32 (!%p190_p3), 1, %v284_v1 }
   0xe   : > { %s557_s12 = smov (!%p234_p4, %s474_s12), 1 }
   0xf   : > { %s522_s16 = sshll.u32 %s557_s12, 3  ;;  %s427_s17 = sshll.u32 %s557_s12, 1 }
  0x10   : > { %s241_s20 = scalar_lea.vmem %s548_s0, %s522_s16  ;;  %s251_s23 = scalar_lea.vmem %s549_s1, %s522_s16 }
  0x11   : > { %s260_s26 = scalar_lea.vmem %s550_s2, %s427_s17  ;;  %v271_v4 = vld [vmem:[%s241_s20] sm:$0xff]  ;;  %s265_s29 = scalar_lea.vmem %s551_s3, %s522_s16 }
  0x12   : > { %v272_v5 = vld [vmem:[%s251_s23] sm:$0xff] }
  0x13   : > { %v273_v6 = vld [vmem:[%s260_s26] sm:$0x3]  ;;  %v274_v7 = vsub.f32 %v271_v4, %v272_v5 }
  0x14   : > { %v286_v8 = vrot.slane %v273_v6, %v285_v2  ;;  %v290_v9 = vrot.slane %v273_v6, %v289_v3 }
  0x15   : > { %v275_v10 = vand.u32 2147483647, %v274_v7  ;;  %v277_v11 = vmul.f32 0.5, %v274_v7 }
  0x16   : > { %v291_v12 = vcombine.low %v286_v8, %v290_v9 }
  0x17   : > { %vm276_vm0 = vcmp.lt.f32.partialorder %v275_v10, 1.0  ;;  %v278_v13 = vmul.f32 %v277_v11, %v274_v7  ;;  %v429_v14 = vadd.f32 -0.5, %v275_v10 }
  0x19   : > { %v280_v15 = vsel %vm276_vm0, %v278_v13, %v429_v14 }
  0x1a   : > { %v293_v16 = vmul.f32 %v291_v12, %v280_v15 }
  0x1c   : > { %v301_v17 = vcombine.high %v293_v16, %v293_v16  ;;  %v304_v18 = vsel %vm303_vm1, %v293_v16, 0.0 }
  0x1e   : > { %v305_v19 = vsel %vm303_vm1, %v301_v17, 0.0 }
  0x1f   : > { %v306_v20 = vadd.f32 %v305_v19, %v304_v18 }
  0x21   : > { %307 = vadd.xlane.f32.xlu0 %v306_v20 }
  0xae   : > { %v308_v21 = vpop.xlane.xlu0 %307 }
  0xaf   : > { %v309_v22 = vrot.slane %v308_v21, 4 }
  0xb1   : > { %v310_v23 = vadd.f32 %v309_v22, %v308_v21 }
  0xb3   : > { %v311_v24 = vrot.slane %v310_v23, 2 }
  0xb5   : > { %v312_v25 = vadd.f32 %v311_v24, %v310_v23 }
  0xb7   : > { %v313_v26 = vrot.slane %v312_v25, 1 }
  0xb9   : > { %v314_v27 = vadd.f32 %v313_v26, %v312_v25 }
  0xbb   : > { %434 = vpush %v314_v27 }
  0xec   : > { %s435_s30 = spop %434 }
  0xed   : > { %v316_v28 = vstv %s435_s30 }
  0xee   : > { %317 = vst [vmem:[%s265_s29] sm:$0xff] %v316_v28 }
  0xef PF: > { %s13_s14 = sadd.s32 1, %s482_s14   ;;  %s552_s12 = smov %s478_s13 }
  0xf0   : > { %p10_p5 = scmp.ge.s32.totalorder %s13_s14, 4   ;;  %s553_s13 = smov %s555_s15 }
  0xf2   :  { %12 = sbr.rel (!%p10_p5) target bundleno = 2 (0x2), region = 76 }

</bundles_post_ra>
